<compile_context>
chip_gen: v6e
topology: v6e:2x2x1
jax: 0.10.0
libtpu: 0.0.40
codegen_flags: <defaults>
</compile_context>

<pallas_src>
import numpy as np
import jax
import jax.numpy as jnp
from jax.experimental import pallas as pl
from jax.experimental.pallas import tpu as pltpu


def _round_up(x, m):
    return ((x + m - 1) // m) * m


def _cdiv(a, b):
    return (a + b - 1) // b


# ---------------------------------------------------------------------------
# Kernel: one batch tile of tanh(Linear -> ReLU -> Linear -> ReLU -> Linear)
# ---------------------------------------------------------------------------
def actor_ppo_forward_kernel(x_ref,
                             w1_ref, b1_ref,
                             w2_ref, b2_ref,
                             w3_ref, b3_ref,
                             out_ref):
    """x_ref:(TILE_B, SD_P) f32 (SD_P = state_dim padded only to 16);
    w*: bf16, VMEM-resident across all grid steps; b1/b2:(1, ND_P) f32;
    b3:(1, action_dim) f32; out_ref:(TILE_B, action_dim) f32 (narrow store)."""
    x = x_ref[...]

    h = jnp.dot(x.astype(jnp.bfloat16), w1_ref[...],
                preferred_element_type=jnp.float32) + b1_ref[...]
    h = jnp.maximum(h, 0.0)

    h = jnp.dot(h.astype(jnp.bfloat16), w2_ref[...],
                preferred_element_type=jnp.float32) + b2_ref[...]
    h = jnp.maximum(h, 0.0)

    # Third matmul at lane-padded N=128 (cheap, VMEM-only), then slice to the
    # true action_dim so the HBM writeback is narrow.
    a = jnp.dot(h.astype(jnp.bfloat16), w3_ref[...],
                preferred_element_type=jnp.float32)
    ad = out_ref.shape[1]
    out_ref[...] = jnp.tanh(a[:, :ad] + b3_ref[...])


# ---------------------------------------------------------------------------
# Parameter handling
# ---------------------------------------------------------------------------
def init_linear(key, in_dim, out_dim):
    """PyTorch nn.Linear default init: U(-1/sqrt(in), 1/sqrt(in)).
    Weight returned already transposed to (in, out)."""
    kw, kb = jax.random.split(key)
    bound = 1.0 / np.sqrt(in_dim)
    w = jax.random.uniform(kw, (in_dim, out_dim), jnp.float32, -bound, bound)
    b = jax.random.uniform(kb, (1, out_dim), jnp.float32, -bound, bound)
    return w, b


def make_params(key, state_dim, net_dim, action_dim):
    k1, k2, k3 = jax.random.split(key, 3)
    w1, b1 = init_linear(k1, state_dim, net_dim)   # net[0]
    w2, b2 = init_linear(k2, net_dim, net_dim)     # net[2]
    w3, b3 = init_linear(k3, net_dim, action_dim)  # net[4]
    return dict(w1=w1, b1=b1, w2=w2, b2=b2, w3=w3, b3=b3)


def prepare_params(params):
    """One-time prep (hoisted out of the forward path): zero-pad and cast
    weights to bf16. Call once at init, reuse the result for every forward."""
    state_dim, net_dim = params["w1"].shape
    action_dim = params["w3"].shape[1]

    sd_p = _round_up(state_dim, 16)    # K of layer 1: bf16 sublane quantum, NOT 128
    nd_p = _round_up(net_dim, 128)     # hidden dim: lane-dense, VMEM-only
    ad_p = _round_up(action_dim, 128)  # matmul-3 N padded; HBM output stays narrow

    def pad_w(w, r, c):
        out = jnp.zeros((r, c), jnp.float32).at[:w.shape[0], :w.shape[1]].set(w)
        return out.astype(jnp.bfloat16)

    def pad_b(b, c):
        return jnp.zeros((1, c), jnp.float32).at[:, :b.shape[1]].set(b)

    return dict(
        w1=pad_w(params["w1"], sd_p, nd_p), b1=pad_b(params["b1"], nd_p),
        w2=pad_w(params["w2"], nd_p, nd_p), b2=pad_b(params["b2"], nd_p),
        w3=pad_w(params["w3"], nd_p, ad_p),
        b3=params["b3"].astype(jnp.float32),   # unpadded (1, action_dim)
    )


# ---------------------------------------------------------------------------
# Wrapper
# ---------------------------------------------------------------------------
def actor_ppo_forward(state, prepared, *, max_tile_b=2048):
    """state: (B, state_dim) f32; prepared: output of prepare_params().
    Returns tanh(net(state)), shape (B, action_dim)."""
    B, state_dim = state.shape
    sd_p, nd_p = prepared["w1"].shape
    ad_p = prepared["w3"].shape[1]
    action_dim = prepared["b3"].shape[1]

    # Batch tiling: nearly-full last tile (no ~2x round-up waste), and >=2
    # grid steps when B > 8 so ("parallel",) shards across both v7x TCs.
    n_tiles = _cdiv(B, max_tile_b)
    if B > 8:
        n_tiles = max(n_tiles, 2)
    tile_b = _round_up(_cdiv(B, n_tiles), 8)
    b_pad = tile_b * n_tiles

    # Skip the wrapper-side copy entirely when already aligned.
    if b_pad != B or sd_p != state_dim:
        x = jnp.zeros((b_pad, sd_p), jnp.float32).at[:B, :state_dim].set(state)
    else:
        x = state

    grid = (n_tiles,)

    in_specs = [
        pl.BlockSpec((tile_b, sd_p), lambda i: (i, 0)),      # state tile (streamed)
        pl.BlockSpec((sd_p, nd_p), lambda i: (0, 0)),        # w1 (resident)
        pl.BlockSpec((1, nd_p), lambda i: (0, 0)),           # b1
        pl.BlockSpec((nd_p, nd_p), lambda i: (0, 0)),        # w2
        pl.BlockSpec((1, nd_p), lambda i: (0, 0)),           # b2
        pl.BlockSpec((nd_p, ad_p), lambda i: (0, 0)),        # w3 (N padded to 128)
        pl.BlockSpec((1, action_dim), lambda i: (0, 0)),     # b3 (unpadded)
    ]
    out_specs = pl.BlockSpec((tile_b, action_dim), lambda i: (i, 0))

    # VMEM budget for the new shapes; clamp <= 28 MiB (safe under v7x's
    # 32 MiB scoped default / 64 MiB physical; v5e/v6e have 128 MiB).
    weight_bytes = ((sd_p * nd_p + nd_p * nd_p + nd_p * ad_p) * 2
                    + (2 * nd_p + action_dim) * 4)
    vmem_bytes = int(min(
        28 * 1024 * 1024,
        2 * tile_b * sd_p * 4            # double-buffered input tile
        + 2 * tile_b * action_dim * 4    # double-buffered narrow output tile
        + 2 * weight_bytes               # resident weights (conservative x2)
        + tile_b * nd_p * (4 + 2) * 2    # f32 + bf16 hidden activations (2 layers)
        + tile_b * ad_p * 4              # pre-slice matmul-3 accumulator
        + (4 << 20)))                    # compiler headroom

    cost = pl.CostEstimate(
        flops=2 * b_pad * (sd_p * nd_p + nd_p * nd_p + nd_p * ad_p),
        transcendentals=b_pad * action_dim,
        bytes_accessed=b_pad * sd_p * 4 + b_pad * action_dim * 4 + weight_bytes,
    )

    out = pl.pallas_call(
        actor_ppo_forward_kernel,
        out_shape=jax.ShapeDtypeStruct((b_pad, action_dim), jnp.float32),
        grid=grid,
        in_specs=in_specs,
        out_specs=out_specs,
        compiler_params=pltpu.CompilerParams(
            dimension_semantics=("parallel",),
            vmem_limit_bytes=vmem_bytes),
        cost_estimate=cost,
    )(x, prepared["w1"], prepared["b1"], prepared["w2"], prepared["b2"],
      prepared["w3"], prepared["b3"])

    return out[:B] if b_pad != B else out


# Jitted entry point for repeated RL inference (shapes static under jit).
actor_ppo_forward_jit = jax.jit(actor_ppo_forward, static_argnames=("max_tile_b",))


# ---------------------------------------------------------------------------
# References
# ---------------------------------------------------------------------------
def reference_forward_f32(state, p):
    """Pure-JAX f32 reference of ActorPPO.forward."""
    h = jnp.maximum(state @ p["w1"] + p["b1"], 0.0)
    h = jnp.maximum(h @ p["w2"] + p["b2"], 0.0)
    return jnp.tanh(h @ p["w3"] + p["b3"])


def reference_forward_bf16(state, p):
    """Matches kernel arithmetic: bf16 matmul operands, f32 accumulation."""
    def mm(x, w):
        return jnp.dot(x.astype(jnp.bfloat16), w.astype(jnp.bfloat16),
                       preferred_element_type=jnp.float32)
    h = jnp.maximum(mm(state, p["w1"]) + p["b1"], 0.0)
    h = jnp.maximum(mm(h, p["w2"]) + p["b2"], 0.0)
    return jnp.tanh(mm(h, p["w3"]) + p["b3"])


if __name__ == "__main__":
    batch, state_dim, net_dim, action_dim = 8, 16, 32, 4

    key = jax.random.PRNGKey(0)
    k_state, k_params = jax.random.split(key)

    state = jax.random.normal(k_state, (batch, state_dim), jnp.float32)
    params = make_params(k_params, state_dim, net_dim, action_dim)
    prepared = prepare_params(params)          # one-time: pad + cast to bf16

    out = jax.block_until_ready(actor_ppo_forward_jit(state, prepared))

    ref_bf16 = reference_forward_bf16(state, params)
    ref_f32 = reference_forward_f32(state, params)
    np.testing.assert_allclose(np.asarray(out), np.asarray(ref_bf16),
                               rtol=5e-3, atol=5e-3)
    np.testing.assert_allclose(np.asarray(out), np.asarray(ref_f32),
                               rtol=5e-2, atol=5e-2)
    assert out.shape == (batch, action_dim)

    # TODO(synk): get_action / get_logprob(_entropy) need in-kernel Gaussian
    # sampling (pltpu.prng_seed / pltpu.stateful_normal); only forward() is fused here.
    print("KERNEL_OK")
</pallas_src>

<mosaic_0001>
module attributes {stable_mosaic.version = 11 : i64} {
  func.func @actor_ppo_forward_kernel(%arg0: i32, %arg1: memref<8x16xf32, #tpu.memory_space<vmem>>, %arg2: memref<16x128xbf16, #tpu.memory_space<vmem>>, %arg3: memref<1x128xf32, #tpu.memory_space<vmem>>, %arg4: memref<128x128xbf16, #tpu.memory_space<vmem>>, %arg5: memref<1x128xf32, #tpu.memory_space<vmem>>, %arg6: memref<128x128xbf16, #tpu.memory_space<vmem>>, %arg7: memref<1x4xf32, #tpu.memory_space<vmem>>, %arg8: memref<8x4xf32, #tpu.memory_space<vmem>>) attributes {dimension_semantics = [#tpu.dimension_semantics<parallel>], iteration_bounds = array<i64: 1>, scalar_prefetch = 0 : i64, scratch_operands = 0 : i64, tpu.core_type = #tpu.core_type<tc>, window_params = [{transform_indices = @transform_0, window_bounds = array<i64: 8, 16>}, {pipeline_mode = #tpu.pipeline_mode<synchronous>, transform_indices = @transform_1, window_bounds = array<i64: 16, 128>}, {pipeline_mode = #tpu.pipeline_mode<synchronous>, transform_indices = @transform_2, window_bounds = array<i64: 1, 128>}, {pipeline_mode = #tpu.pipeline_mode<synchronous>, transform_indices = @transform_3, window_bounds = array<i64: 128, 128>}, {pipeline_mode = #tpu.pipeline_mode<synchronous>, transform_indices = @transform_4, window_bounds = array<i64: 1, 128>}, {pipeline_mode = #tpu.pipeline_mode<synchronous>, transform_indices = @transform_5, window_bounds = array<i64: 128, 128>}, {pipeline_mode = #tpu.pipeline_mode<synchronous>, transform_indices = @transform_6, window_bounds = array<i64: 1, 4>}, {transform_indices = @transform_7, window_bounds = array<i64: 8, 4>}]} {
    %c0 = arith.constant 0 : index
    %c0_0 = arith.constant 0 : index
    %0 = vector.load %arg1[%c0, %c0_0] : memref<8x16xf32, #tpu.memory_space<vmem>>, vector<8x16xf32>
    %1 = arith.truncf %0 : vector<8x16xf32> to vector<8x16xbf16>
    %c0_1 = arith.constant 0 : index
    %c0_2 = arith.constant 0 : index
    %2 = vector.load %arg2[%c0_1, %c0_2] : memref<16x128xbf16, #tpu.memory_space<vmem>>, vector<16x128xbf16>
    %cst = arith.constant dense<0.000000e+00> : vector<8x128xf32>
    %3 = tpu.matmul %1, %2, %cst {dimension_numbers = #tpu.dot_dimension_numbers<[1], [0], [0], [1], [0, 0, 1, 1], [], []>} : vector<8x16xbf16>, vector<16x128xbf16>, vector<8x128xf32> -> vector<8x128xf32>
    %c0_3 = arith.constant 0 : index
    %c0_4 = arith.constant 0 : index
    %4 = vector.load %arg3[%c0_3, %c0_4] : memref<1x128xf32, #tpu.memory_space<vmem>>, vector<1x128xf32>
    %5 = vector.broadcast %4 : vector<1x128xf32> to vector<8x128xf32>
    %6 = arith.addf %3, %5 : vector<8x128xf32>
    %cst_5 = arith.constant 0.000000e+00 : f32
    %7 = vector.broadcast %cst_5 : f32 to vector<8x128xf32>
    %8 = arith.maximumf %6, %7 : vector<8x128xf32>
    %9 = arith.truncf %8 : vector<8x128xf32> to vector<8x128xbf16>
    %c0_6 = arith.constant 0 : index
    %c0_7 = arith.constant 0 : index
    %10 = vector.load %arg4[%c0_6, %c0_7] : memref<128x128xbf16, #tpu.memory_space<vmem>>, vector<128x128xbf16>
    %cst_8 = arith.constant dense<0.000000e+00> : vector<8x128xf32>
    %11 = tpu.matmul %9, %10, %cst_8 {dimension_numbers = #tpu.dot_dimension_numbers<[1], [0], [0], [1], [0, 0, 1, 1], [], []>} : vector<8x128xbf16>, vector<128x128xbf16>, vector<8x128xf32> -> vector<8x128xf32>
    %c0_9 = arith.constant 0 : index
    %c0_10 = arith.constant 0 : index
    %12 = vector.load %arg5[%c0_9, %c0_10] : memref<1x128xf32, #tpu.memory_space<vmem>>, vector<1x128xf32>
    %13 = vector.broadcast %12 : vector<1x128xf32> to vector<8x128xf32>
    %14 = arith.addf %11, %13 : vector<8x128xf32>
    %cst_11 = arith.constant 0.000000e+00 : f32
    %15 = vector.broadcast %cst_11 : f32 to vector<8x128xf32>
    %16 = arith.maximumf %14, %15 : vector<8x128xf32>
    %17 = arith.truncf %16 : vector<8x128xf32> to vector<8x128xbf16>
    %c0_12 = arith.constant 0 : index
    %c0_13 = arith.constant 0 : index
    %18 = vector.load %arg6[%c0_12, %c0_13] : memref<128x128xbf16, #tpu.memory_space<vmem>>, vector<128x128xbf16>
    %cst_14 = arith.constant dense<0.000000e+00> : vector<8x128xf32>
    %19 = tpu.matmul %17, %18, %cst_14 {dimension_numbers = #tpu.dot_dimension_numbers<[1], [0], [0], [1], [0, 0, 1, 1], [], []>} : vector<8x128xbf16>, vector<128x128xbf16>, vector<8x128xf32> -> vector<8x128xf32>
    %20 = vector.extract_strided_slice %19 {offsets = [0, 0], sizes = [8, 4], strides = [1, 1]} : vector<8x128xf32> to vector<8x4xf32>
    %c0_15 = arith.constant 0 : index
    %c0_16 = arith.constant 0 : index
    %21 = vector.load %arg7[%c0_15, %c0_16] : memref<1x4xf32, #tpu.memory_space<vmem>>, vector<1x4xf32>
    %22 = vector.broadcast %21 : vector<1x4xf32> to vector<8x4xf32>
    %23 = arith.addf %20, %22 : vector<8x4xf32>
    %24 = math.tanh %23 : vector<8x4xf32>
    %c0_17 = arith.constant 0 : index
    %c0_18 = arith.constant 0 : index
    %25 = vector.load %arg8[%c0_17, %c0_18] : memref<8x4xf32, #tpu.memory_space<vmem>>, vector<8x4xf32>
    tpu.vector_store %arg8[%c0_17, %c0_18], %24 {strides = array<i32>} : memref<8x4xf32, #tpu.memory_space<vmem>>, vector<8x4xf32>,
    return
  }
  func.func @transform_0(%arg0: i32) -> (i32, i32) {
    %c0_i32 = arith.constant 0 : i32
    %c0_i32_0 = arith.constant 0 : i32
    return %arg0, %c0_i32 : i32, i32
  }
  func.func @transform_1(%arg0: i32) -> (i32, i32) {
    %c0_i32 = arith.constant 0 : i32
    %c0_i32_0 = arith.constant 0 : i32
    %c0_i32_1 = arith.constant 0 : i32
    return %c0_i32, %c0_i32_0 : i32, i32
  }
  func.func @transform_2(%arg0: i32) -> (i32, i32) {
    %c0_i32 = arith.constant 0 : i32
    %c0_i32_0 = arith.constant 0 : i32
    %c0_i32_1 = arith.constant 0 : i32
    return %c0_i32, %c0_i32_0 : i32, i32
  }
  func.func @transform_3(%arg0: i32) -> (i32, i32) {
    %c0_i32 = arith.constant 0 : i32
    %c0_i32_0 = arith.constant 0 : i32
    %c0_i32_1 = arith.constant 0 : i32
    return %c0_i32, %c0_i32_0 : i32, i32
  }
  func.func @transform_4(%arg0: i32) -> (i32, i32) {
    %c0_i32 = arith.constant 0 : i32
    %c0_i32_0 = arith.constant 0 : i32
    %c0_i32_1 = arith.constant 0 : i32
    return %c0_i32, %c0_i32_0 : i32, i32
  }
  func.func @transform_5(%arg0: i32) -> (i32, i32) {
    %c0_i32 = arith.constant 0 : i32
    %c0_i32_0 = arith.constant 0 : i32
    %c0_i32_1 = arith.constant 0 : i32
    return %c0_i32, %c0_i32_0 : i32, i32
  }
  func.func @transform_6(%arg0: i32) -> (i32, i32) {
    %c0_i32 = arith.constant 0 : i32
    %c0_i32_0 = arith.constant 0 : i32
    %c0_i32_1 = arith.constant 0 : i32
    return %c0_i32, %c0_i32_0 : i32, i32
  }
  func.func @transform_7(%arg0: i32) -> (i32, i32) {
    %c0_i32 = arith.constant 0 : i32
    %c0_i32_0 = arith.constant 0 : i32
    return %arg0, %c0_i32 : i32, i32
  }
}

</mosaic_0001>

<bundles_post_ra>
// kernel: actor_ppo_forward.1
= control target key start
LH: loop header
LB: loop body
LE: loop exit
PB: predicated region body
PF: predicated region fallthrough
CT: control target
= control target key end

     0   :  { %12 = vsyncpa [#allocation3], 0  ;;  %s679_s0 = inlined_call_operand.hbm [shape: f32[8,16], index: 0, kind: input, shape index: {}]   ;;  %s680_s1 = inlined_call_operand.hbm [shape: bf16[16,128], index: 1, kind: input, shape index: {}]   ;;  %s681_s2 = inlined_call_operand.vmem [shape: f32[1,128], index: 2, kind: input, shape index: {}]   ;;  %s682_s3 = inlined_call_operand.hbm [shape: bf16[128,128], index: 3, kind: input, shape index: {}]   ;;  %s683_s4 = inlined_call_operand.vmem [shape: f32[1,128], index: 4, kind: input, shape index: {}]   ;;  %s684_s5 = inlined_call_operand.hbm [shape: bf16[128,128], index: 5, kind: input, shape index: {}]   ;;  %s685_s6 = inlined_call_operand.vmem [shape: f32[1,4], index: 6, kind: input, shape index: {}]   ;;  %s686_s7 = inlined_call_operand.vmem [shape: f32[8,4], index: 7, kind: output, shape index: {}]  }
   0x1   :  { %13 = vsyncpa [#allocation5], 0 }
   0x2   :  { %14 = vsyncpa [#allocation8], 0  ;;  %s578_s24 = smov [#allocation4]  }
   0x3   :  { %s30_s25 = sshll.u32 %s578_s24, 4  ;;  %s31_s25 = int_to_ptr.vmem [resolvable:$true] %s30_s25 }
   0x4   :  { %s500_s26 = scalar_lea.vmem %s31_s25, 128  ;;  %p505_p1 = scmp.lt.s32.totalorder %s31_s25, %s31_s25 }
   0x5   :  { %p501_p0 = scmp.ne.s32.totalorder %s31_s25, %s500_s26  ;;  %p506_p2 = scmp.lt.s32.totalorder %s500_s26, %s500_s26 }
   0x7   :  { %p507_p3 = por %p506_p2, %p505_p1 }
   0x9   :  { %p508_p4 = pnand %p507_p3, %p501_p0 }
   0xb   :  { %511 = shalt.err (!%p508_p4)
}
   0xc   :  { %s579_s27 = smov 64   ;;  %s580_s28 = smov 4  }
   0xd   :  { %36 = dma.hbm_to_vmem [thread:$0]  %s680_s1, 128, %s31_s25, [#allocation5], %s579_s27, %s579_s27, %s580_s28  }
   0xe   :  { %s581_s8 = smov [#allocation2]   ;;  %s582_s10 = smov [#allocation6]  }
   0xf   :  { %s21_s9 = sshll.u32 %s581_s8, 4  ;;  %s44_s11 = sshll.u32 %s582_s10, 4  ;;  %s22_s9 = int_to_ptr.vmem [resolvable:$true] %s21_s9  ;;  %s45_s11 = int_to_ptr.vmem [resolvable:$true] %s44_s11 }
  0x10   :  { %s520_s12 = scalar_lea.vmem %s22_s9, 128  ;;  %p525_p6 = scmp.lt.s32.totalorder %s22_s9, %s22_s9 }
  0x11   :  { %p521_p5 = scmp.ne.s32.totalorder %s22_s9, %s520_s12  ;;  %p526_p7 = scmp.lt.s32.totalorder %s520_s12, %s520_s12 }
  0x13   :  { %p527_p8 = por %p526_p7, %p525_p6 }
  0x15   :  { %p528_p9 = pnand %p527_p8, %p521_p5 }
  0x17   :  { %531 = shalt.err (!%p528_p9)
}
  0x18   :  { %24 = dma.hbm_to_vmem [thread:$0]  %s679_s0, 128, %s22_s9, [#allocation3]  }
  0x19   :  { %s540_s15 = scalar_lea.vmem %s45_s11, 1024  ;;  %p545_p11 = scmp.lt.s32.totalorder %s45_s11, %s45_s11 }
  0x1a   :  { %p541_p10 = scmp.ne.s32.totalorder %s45_s11, %s540_s15  ;;  %p546_p12 = scmp.lt.s32.totalorder %s540_s15, %s540_s15 }
  0x1c   :  { %p547_p13 = por %p546_p12, %p545_p11 }
  0x1e   :  { %p548_p0 = pnand %p547_p13, %p541_p10 }
  0x20   :  { %551 = shalt.err (!%p548_p0)
}
  0x21   :  { %50 = dma.hbm_to_vmem [thread:$0]  %s682_s3, 1024, %s45_s11, [#allocation5], %s579_s27, %s579_s27, %s580_s28  }
  0x22   :  { %s583_s17 = smov [#allocation7]  }
  0x23   :  { %s58_s18 = sshll.u32 %s583_s17, 4  ;;  %s59_s18 = int_to_ptr.vmem [resolvable:$true] %s58_s18 }
  0x24   :  { %s560_s19 = scalar_lea.vmem %s59_s18, 1024  ;;  %p565_p2 = scmp.lt.s32.totalorder %s59_s18, %s59_s18 }
  0x25   :  { %p561_p1 = scmp.ne.s32.totalorder %s59_s18, %s560_s19  ;;  %p566_p3 = scmp.lt.s32.totalorder %s560_s19, %s560_s19 }
  0x27   :  { %p567_p4 = por %p566_p3, %p565_p2 }
  0x29   :  { %p568_p5 = pnand %p567_p4, %p561_p1 }
  0x2b   :  { %571 = shalt.err (!%p568_p5)
}
  0x2c   :  { %64 = dma.hbm_to_vmem [thread:$0]  %s684_s5, 1024, %s59_s18, [#allocation8], %s579_s27, %s579_s27, %s580_s28  }
  0x2d   :  { %572 = dma.done.wait [#allocation3], 128  }
  0x2e   :  { %573 = vsyncadd [#allocation3], 4294967168 }
  0x2f   :  { %574 = dma.done.wait [#allocation5], 1152  }
  0x30   :  { %575 = vsyncadd [#allocation5], 4294966144 }
  0x31   :  { %576 = dma.done.wait [#allocation8], 1024  }
  0x32   :  { %577 = vsyncadd [#allocation8], 4294966272  ;;  %v584_v0 = vmov 0.0   ;;  %vm585_vm0 = vmmov 0   ;;  %v473_v1 = vld [vmem:[#allocation4] sm:$0xff]   ;;  %v80_v2 = vld [vmem:[#allocation2] sm:$0xff] }
  0x33   :  { %419 = vmatprep.subr.bf16.mxu0 %v584_v0  ;;  %421 = vmatprep.mubr.msk.bf16.mxu0 %vm585_vm0, %v584_v0  ;;  %v81_v3 = vpack.c.bf16 %v80_v2, %v80_v2  ;;  %vm97_vm1 = vcmask 130048   ;;  %v474_v4 = vld [vmem:[#allocation6 + $0x38] sm:$0xff]   ;;  %v475_v5 = vld [vmem:[#allocation6 + $0x30] sm:$0xff]   ;;  %v476_v6 = vld [vmem:[#allocation6 + $0x28] sm:$0xff]   ;;  %vm369_vm2 = vcmask 31744  }
  0x34   :  { %425 = vmatprep.subr.bf16.mxu1 %v584_v0  ;;  %441 = vmatprep.mubr.msk.bf16.mxu1 %vm585_vm0, %v584_v0  ;;  %v477_v7 = vld [vmem:[#allocation6 + $0x20] sm:$0xff]   ;;  %v478_v8 = vld [vmem:[#allocation6 + $0x18] sm:$0xff]   ;;  %v479_v9 = vld [vmem:[#allocation6 + $0x10] sm:$0xff]  }
  0x35   :  { %420 = vmatpush3.bf16.msra.mxu0 %v473_v1  ;;  %426 = vmatpush3.bf16.msra.mxu1 %v474_v4  ;;  %v480_v10 = vld [vmem:[#allocation6 + $0x8] sm:$0xff]   ;;  %v481_v11 = vld [vmem:[#allocation6] sm:$0xff]   ;;  %v482_v12 = vld [vmem:[#allocation7 + $0x38] sm:$0xff]  }
  0x36   :  { %445 = vmatprep.subr.bf16.mxu0 %v584_v0  ;;  %427 = vmatprep.subr.bf16.mxu1 %v584_v0  ;;  %v483_v13 = vld [vmem:[#allocation7 + $0x30] sm:$0xff]   ;;  %v484_v14 = vld [vmem:[#allocation7 + $0x28] sm:$0xff]   ;;  %v485_v15 = vld [vmem:[#allocation7 + $0x20] sm:$0xff]  }
  0x37   :  { %v486_v16 = vld [vmem:[#allocation7 + $0x18] sm:$0xff]   ;;  %v487_v17 = vld [vmem:[#allocation7 + $0x10] sm:$0xff]   ;;  %v488_v26 = vld [vmem:[#allocation7 + $0x8] sm:$0xff]  }
  0x38   :  { %422 = vmatmul.mubr.msk.bf16.vlgmr.msra.gmra.mxu0 %vm97_vm1, %v81_v3  ;;  %v378_v18 = vld [vmem:[%s681_s2] ss:$0 sm:$0xff]  ;;  %v489_v27 = vld [vmem:[#allocation7] sm:$0xff]  }
  0x39   :  { %461 = vmatprep.mubr.msk.bf16.mxu0 %vm585_vm0, %v584_v0  ;;  %428 = vmatpush3.bf16.msra.mxu1 %v475_v5  ;;  %v381_v28 = vld [vmem:[%s683_s4] ss:$0 sm:$0xff] }
  0x3a   :  { %429 = vmatprep.subr.bf16.mxu1 %v584_v0  ;;  %446 = vmatpush3.bf16.msra.mxu0 %v482_v12  ;;  %v398_v36 = vld [vmem:[%s685_s6] ss:$0 sm:$0xff] }
  0x3b   :  { %447 = vmatprep.subr.bf16.mxu0 %v584_v0 }
  0x3d   :  { %430 = vmatpush3.bf16.msra.mxu1 %v476_v6 }
  0x3e   :  { %431 = vmatprep.subr.bf16.mxu1 %v584_v0  ;;  %448 = vmatpush3.bf16.msra.mxu0 %v483_v13 }
  0x3f   :  { %449 = vmatprep.subr.bf16.mxu0 %v584_v0 }
  0x41   :  { %432 = vmatpush3.bf16.msra.mxu1 %v477_v7 }
  0x42   :  { %433 = vmatprep.subr.bf16.mxu1 %v584_v0  ;;  %450 = vmatpush3.bf16.msra.mxu0 %v484_v14 }
  0x43   :  { %451 = vmatprep.subr.bf16.mxu0 %v584_v0 }
  0x45   :  { %434 = vmatpush3.bf16.msra.mxu1 %v478_v8 }
  0x46   :  { %435 = vmatprep.subr.bf16.mxu1 %v584_v0  ;;  %452 = vmatpush3.bf16.msra.mxu0 %v485_v15 }
  0x47   :  { %453 = vmatprep.subr.bf16.mxu0 %v584_v0 }
  0x49   :  { %436 = vmatpush3.bf16.msra.mxu1 %v479_v9 }
  0x4a   :  { %437 = vmatprep.subr.bf16.mxu1 %v584_v0  ;;  %454 = vmatpush3.bf16.msra.mxu0 %v486_v16 }
  0x4b   :  { %455 = vmatprep.subr.bf16.mxu0 %v584_v0 }
  0x4d   :  { %438 = vmatpush3.bf16.msra.mxu1 %v480_v10 }
  0x4e   :  { %439 = vmatprep.subr.bf16.mxu1 %v584_v0  ;;  %456 = vmatpush3.bf16.msra.mxu0 %v487_v17 }
  0x4f   :  { %457 = vmatprep.subr.bf16.mxu0 %v584_v0 }
  0x51   :  { %440 = vmatpush3.bf16.msra.mxu1 %v481_v11 }
  0x52   :  { %458 = vmatpush3.bf16.msra.mxu0 %v488_v26 }
  0x53   :  { %459 = vmatprep.subr.bf16.mxu0 %v584_v0 }
  0x56   :  { %460 = vmatpush3.bf16.msra.mxu0 %v489_v27 }
  0xf8   :  { %v135_v19 = vpop.f32.mrf.mxu0 }
  0xf9   :  { %v136_v20 = vadd.f32 %v378_v18, %v135_v19 }
  0xfa   :  { %v423_v21 = vpop.f32.mrf.mxu0 }
  0xfb   :  { %v141_v22 = vmax.f32 %v136_v20, 0.0 }
  0xfc   :  { %v138_v23 = vpop.f32.mrf.mxu0 }
  0xfd   :  { %v142_v24 = vpack.c.bf16 %v141_v22, %v141_v22 }
  0xfe   :  { %v424_v25 = vpop.f32.mrf.mxu0 }
  0xff   :  { %442 = vmatmul.mubr.bf16.vlgmr.msra.gmra.mxu1 %v142_v24 }
 0x1bf   :  { %v248_v29 = vpop.f32.mrf.mxu1 }
 0x1c0   :  { %v249_v30 = vadd.f32 %v381_v28, %v248_v29 }
 0x1c1   :  { %v443_v31 = vpop.f32.mrf.mxu1 }
 0x1c2   :  { %v254_v32 = vmax.f32 %v249_v30, 0.0 }
 0x1c3   :  { %v251_v33 = vpop.f32.mrf.mxu1 }
 0x1c4   :  { %v255_v34 = vpack.c.bf16 %v254_v32, %v254_v32 }
 0x1c5   :  { %v444_v35 = vpop.f32.mrf.mxu1 }
 0x1c6   :  { %462 = vmatmul.mubr.bf16.vlgmr.msra.gmra.mxu0 %v255_v34 }
 0x286   :  { %v354_v37 = vpop.f32.mrf.mxu0 }
 0x287   :  { %v367_v38 = vadd.f32 %v398_v36, %v354_v37 }
 0x288   :  { %v463_v39 = vpop.f32.mrf.mxu0 }
 0x289   :  { %490 = vtanh.f32 %v367_v38 }
 0x28a   :  { %v357_v40 = vpop.f32.mrf.mxu0 }
 0x28c   :  { %v464_v41 = vpop.f32.mrf.mxu0 }
 0x296   :  { %v491_v42 = vpop.eup %490 }
 0x297   :  { %370 = vst.msk [vmem:[%s686_s7] sm:$0xff] %vm369_vm2, %v491_v42 }
 0x298   :  { %375 = vsyncpa [#allocation3], 1 }
 0x299   :  { %376 = vsyncpa [#allocation5], 1 }
 0x29a   :  { %377 = vsyncpa [#allocation8], 1 }

</bundles_post_ra>
